<compile_context>
chip_gen: v7x
topology: tpu7x:2x2x1
jax: 0.10.0
libtpu: 0.0.40
codegen_flags: <defaults>
</compile_context>

<pallas_src>
import functools

import jax
import jax.numpy as jnp
from jax.experimental import pallas as pl
from jax.experimental.pallas import tpu as pltpu


def _round_up(x: int, m: int) -> int:
    return ((x + m - 1) // m) * m


def _lm_head_kernel(x_ref, w_ref, b_ref, o_ref):
    # x_ref: (tm, H) bf16   w_ref: (H, tn) bf16   b_ref: (1, tn) f32
    # o_ref: (tm, tn) out dtype
    # Dropout is identity at inference time -> no-op here.
    # TODO(synk): training-mode dropout (stateful PRNG mask) not implemented.
    acc = jnp.dot(x_ref[...], w_ref[...], preferred_element_type=jnp.float32)
    o_ref[...] = (acc + b_ref[...]).astype(o_ref.dtype)  # epilogue stays f32


def prepare_lm_head_params(weight, bias, *, compute_dtype=jnp.bfloat16):
    """One-time parameter prep (do at load time, NOT per forward call).

    weight: [V, H] (PyTorch nn.Linear layout), bias: [V].
    Returns (w_t, b2, V):
      w_t : [H, Vp]  weight transposed, vocab padded to a multiple of 128,
            cast to `compute_dtype` (bf16 by default).
      b2  : [1, Vp]  bias in f32 (padded with zeros).
      V   : original vocab size (for slicing the output).
    """
    V, H = weight.shape
    Vp = _round_up(V, 128)
    w_t = jnp.zeros((H, Vp), dtype=compute_dtype)
    w_t = w_t.at[:, :V].set(weight.T.astype(compute_dtype))
    b2 = jnp.zeros((1, Vp), dtype=jnp.float32)
    b2 = b2.at[:, :V].set(bias.astype(jnp.float32).reshape(1, V))
    return w_t, b2, V


@functools.partial(jax.jit, static_argnames=("vocab_size", "tm", "tn"))
def speech_recognition_head(x, w_t, b2, vocab_size, *, tm=256, tn=512):
    """x: [B, S, H]; w_t: [H, Vp] (pre-transposed/padded); b2: [1, Vp] f32."""
    B, S, H = x.shape
    Hw, Vp = w_t.shape
    assert Hw == H and Vp % 128 == 0

    compute_dtype = w_t.dtype
    out_dtype = x.dtype
    M = B * S

    x2 = x.reshape(M, H).astype(compute_dtype)

    # Token tile: multiple of 8 sublanes, no bigger than the (padded) token
    # count; pad tokens instead of asserting divisibility.
    tm = _round_up(max(int(tm), 8), 8)
    tm = min(tm, _round_up(M, 8))
    Mp = _round_up(M, tm)
    if Mp != M:
        x2 = jnp.pad(x2, ((0, Mp - M), (0, 0)))

    # Vocab tile: multiple of 128 that divides the padded vocab.
    tn = min(_round_up(max(int(tn), 128), 128), Vp)
    while Vp % tn != 0:
        tn -= 128

    grid = (Mp // tm, Vp // tn)

    # Advisory cost for XLA scheduling around this custom call.
    bytes_accessed = (
        Mp * H * x2.dtype.itemsize
        + H * Vp * w_t.dtype.itemsize
        + Vp * 4
        + Mp * Vp * jnp.dtype(out_dtype).itemsize
    )
    cost = pl.CostEstimate(
        flops=2 * Mp * H * Vp, transcendentals=0, bytes_accessed=bytes_accessed
    )

    # Explicit VMEM budget: double-buffered x / w / b / out blocks + headroom
    # (keeps realistic LM-head sizes pipelined, safe on v7x's 64 MiB VMEM).
    block_bytes = 2 * (
        tm * H * x2.dtype.itemsize
        + H * tn * w_t.dtype.itemsize
        + tn * 4
        + tm * tn * jnp.dtype(out_dtype).itemsize
    )
    vmem_limit = int(min(max(32 * 1024 * 1024, 2 * block_bytes), 56 * 1024 * 1024))

    out = pl.pallas_call(
        _lm_head_kernel,
        out_shape=jax.ShapeDtypeStruct((Mp, Vp), out_dtype),
        grid_spec=pltpu.PrefetchScalarGridSpec(
            num_scalar_prefetch=0,
            grid=grid,
            in_specs=[
                pl.BlockSpec((tm, H), lambda i, j: (i, 0)),   # x tokens tile
                pl.BlockSpec((H, tn), lambda i, j: (0, j)),   # weight V-tile
                pl.BlockSpec((1, tn), lambda i, j: (0, j)),   # bias V-tile
            ],
            out_specs=pl.BlockSpec((tm, tn), lambda i, j: (i, j)),
        ),
        compiler_params=pltpu.CompilerParams(
            dimension_semantics=("parallel", "parallel"),
            vmem_limit_bytes=vmem_limit,
        ),
        cost_estimate=cost,
    )(x2, w_t, b2)

    return out[:M, :vocab_size].reshape(B, S, vocab_size)


def _reference(x, weight, bias):
    return jnp.einsum("bsh,vh->bsv", x, weight) + bias


if __name__ == "__main__":
    # Small shapes consistent with the module's forward:
    #   embedding [B, S, H]; lm_head: Linear(H -> V), V=32 (wav2vec2 CTC vocab).
    B, S, H, V = 2, 16, 256, 32

    key = jax.random.PRNGKey(0)
    kx, kw, kb = jax.random.split(key, 3)

    x = jax.random.normal(kx, (B, S, H), dtype=jnp.float32)
    # Deterministic synthetic parameters (shapes match nn.Linear(H, V)).
    weight = jax.random.normal(kw, (V, H), dtype=jnp.float32) * (1.0 / H**0.5)
    bias = jax.random.normal(kb, (V,), dtype=jnp.float32) * 0.01

    # One-time parameter prep (transpose / pad / cast happens here, not per call).
    w_t, b2, vocab = prepare_lm_head_params(weight, bias)
    w_t, b2 = jax.block_until_ready((w_t, b2))

    out = jax.block_until_ready(speech_recognition_head(x, w_t, b2, vocab))

    ref = _reference(x, weight, bias)
    assert out.shape == (B, S, V)
    # bf16 MXU inputs -> loosen tolerance vs the f32 reference.
    assert jnp.allclose(out, ref, atol=5e-2, rtol=5e-2)

    print("KERNEL_OK")
</pallas_src>

<mosaic_0001>
module attributes {stable_mosaic.version = 11 : i64} {
  func.func @_lm_head_kernel(%arg0: i32, %arg1: i32, %arg2: memref<32x256xbf16, #tpu.memory_space<vmem>>, %arg3: memref<256x128xbf16, #tpu.memory_space<vmem>>, %arg4: memref<1x128xf32, #tpu.memory_space<vmem>>, %arg5: memref<32x128xf32, #tpu.memory_space<vmem>>) attributes {dimension_semantics = [#tpu.dimension_semantics<parallel>, #tpu.dimension_semantics<parallel>], iteration_bounds = array<i64: 1, 1>, scalar_prefetch = 0 : i64, scratch_operands = 0 : i64, tpu.core_type = #tpu.core_type<tc>, window_params = [{transform_indices = @transform_0, window_bounds = array<i64: 32, 256>}, {transform_indices = @transform_1, window_bounds = array<i64: 256, 128>}, {transform_indices = @transform_2, window_bounds = array<i64: 1, 128>}, {transform_indices = @transform_3, window_bounds = array<i64: 32, 128>}]} {
    %c0 = arith.constant 0 : index
    %c0_0 = arith.constant 0 : index
    %0 = vector.load %arg2[%c0, %c0_0] : memref<32x256xbf16, #tpu.memory_space<vmem>>, vector<32x256xbf16>
    %c0_1 = arith.constant 0 : index
    %c0_2 = arith.constant 0 : index
    %1 = vector.load %arg3[%c0_1, %c0_2] : memref<256x128xbf16, #tpu.memory_space<vmem>>, vector<256x128xbf16>
    %cst = arith.constant dense<0.000000e+00> : vector<32x128xf32>
    %2 = tpu.matmul %0, %1, %cst {dimension_numbers = #tpu.dot_dimension_numbers<[1], [0], [0], [1], [0, 0, 1, 1], [], []>} : vector<32x256xbf16>, vector<256x128xbf16>, vector<32x128xf32> -> vector<32x128xf32>
    %c0_3 = arith.constant 0 : index
    %c0_4 = arith.constant 0 : index
    %3 = vector.load %arg4[%c0_3, %c0_4] : memref<1x128xf32, #tpu.memory_space<vmem>>, vector<1x128xf32>
    %4 = vector.broadcast %3 : vector<1x128xf32> to vector<32x128xf32>
    %5 = arith.addf %2, %4 : vector<32x128xf32>
    %c0_5 = arith.constant 0 : index
    %c0_6 = arith.constant 0 : index
    %6 = vector.load %arg5[%c0_5, %c0_6] : memref<32x128xf32, #tpu.memory_space<vmem>>, vector<32x128xf32>
    tpu.vector_store %arg5[%c0_5, %c0_6], %5 {strides = array<i32>} : memref<32x128xf32, #tpu.memory_space<vmem>>, vector<32x128xf32>,
    return
  }
  func.func @transform_0(%arg0: i32, %arg1: i32) -> (i32, i32) {
    %c0_i32 = arith.constant 0 : i32
    %c0_i32_0 = arith.constant 0 : i32
    return %arg0, %c0_i32 : i32, i32
  }
  func.func @transform_1(%arg0: i32, %arg1: i32) -> (i32, i32) {
    %c0_i32 = arith.constant 0 : i32
    %c0_i32_0 = arith.constant 0 : i32
    return %c0_i32, %arg1 : i32, i32
  }
  func.func @transform_2(%arg0: i32, %arg1: i32) -> (i32, i32) {
    %c0_i32 = arith.constant 0 : i32
    %c0_i32_0 = arith.constant 0 : i32
    return %c0_i32, %arg1 : i32, i32
  }
  func.func @transform_3(%arg0: i32, %arg1: i32) -> (i32, i32) {
    %c0_i32 = arith.constant 0 : i32
    return %arg0, %arg1 : i32, i32
  }
}

</mosaic_0001>

<bundles_post_ra>
// kernel: speech_recognition_head.1
= control target key start
LH: loop header
LB: loop body
LE: loop exit
PB: predicated region body
PF: predicated region fallthrough
CT: control target
= control target key end

     0   :  { %8 = vsyncpa [#allocation3], 0  ;;  %s465_s0 = inlined_call_operand.vmem [shape: bf16[32,256], index: 0, kind: input, shape index: {}]   ;;  %s466_s1 = inlined_call_operand.hbm [shape: bf16[256,128], index: 1, kind: input, shape index: {}]   ;;  %s467_s2 = inlined_call_operand.vmem [shape: f32[1,128], index: 2, kind: input, shape index: {}]   ;;  %s468_s3 = inlined_call_operand.hbm [shape: f32[32,128], index: 3, kind: output, shape index: {}]  }
   0x1   :  { %9 = vsyncpa [#allocation4], 0  ;;  %s400_s12 = smov [#allocation2]   ;;  %s352_s16 = scalar_lea.hbm %s466_s1, 2048 }
   0x2   :  { %s17_s13 = sshll.u32 %s400_s12, 4  ;;  %p353_p0 = scmp.ne.s32.totalorder %s466_s1, %s352_s16  ;;  %s18_s13 = int_to_ptr.vmem [resolvable:$true] %s17_s13 }
   0x3   :  { %p356_p1 = scmp.lt.u32.totalorder %s352_s16, %s466_s1 }
   0x5   :  { %p358_p2 = pnand %p356_p1, %p353_p0 }
   0x7   :  { %361 = shalt.err (!%p358_p2)
}
   0x8   :  { %s362_s21 = scalar_lea.vmem %s18_s13, 2048  ;;  %p367_p4 = scmp.lt.s32.totalorder %s18_s13, %s18_s13 }
   0x9   :  { %p363_p3 = scmp.ne.s32.totalorder %s18_s13, %s362_s21  ;;  %p368_p5 = scmp.lt.s32.totalorder %s362_s21, %s362_s21 }
   0xb   :  { %p369_p6 = por %p368_p5, %p367_p4 }
   0xd   :  { %p370_p7 = pnand %p369_p6, %p363_p3 }
   0xf   :  { %373 = shalt.err (!%p370_p7)
}
  0x10   :  { %s401_s22 = smov 64   ;;  %s402_s23 = smov 4  }
  0x11   :  { %23 = dma.hbm_to_vmem [thread:$0]  %s466_s1, 2048, %s18_s13, [#allocation3], %s401_s22, %s401_s22, %s402_s23  }
  0x12   :  { %396 = dma.done.wait [#allocation3], 2048  }
  0x13   :  { %397 = vsyncadd [#allocation3], 4294965248  ;;  %v330_v0 = vld [vmem:[#allocation2 + $0x40] sm:$0xff]   ;;  %v332_v2 = vld [vmem:[#allocation2 + $0x48] sm:$0xff]   ;;  %s403_s8 = smov [#allocation5]  }
  0x14   :  { %v331_v1 = vld [vmem:[#allocation2] sm:$0xff]   ;;  %280 = vmatprep.subr.bf16.mxu0 %v330_v0  ;;  %308 = vmatprep.subr.bf16.mxu1 %v330_v0  ;;  %v333_v3 = vld [vmem:[#allocation2 + $0x8] sm:$0xff]   ;;  %v334_v4 = vld [vmem:[#allocation2 + $0x50] sm:$0xff]   ;;  %s247_s9 = sshll.u32 %s403_s8, 4  ;;  %s248_s9 = int_to_ptr.vmem [resolvable:$true] %s247_s9 }
  0x15   :  { %281 = vmatpush3.bf16.msra.mxu0 %v331_v1  ;;  %316 = vmatpush3.bf16.msra.mxu1 %v331_v1  ;;  %v335_v5 = vld [vmem:[#allocation2 + $0x10] sm:$0xff]   ;;  %v336_v6 = vld [vmem:[#allocation2 + $0x58] sm:$0xff]   ;;  %v338_v8 = vld [vmem:[#allocation2 + $0x60] sm:$0xff]   ;;  %p379_p9 = scmp.lt.s32.totalorder %s248_s9, %s248_s9 }
  0x16   :  { %282 = vmatprep.subr.bf16.mxu0 %v332_v2  ;;  %309 = vmatprep.subr.bf16.mxu1 %v332_v2  ;;  %v337_v7 = vld [vmem:[#allocation2 + $0x18] sm:$0xff]   ;;  %v339_v9 = vld [vmem:[#allocation2 + $0x20] sm:$0xff]   ;;  %v340_v10 = vld [vmem:[#allocation2 + $0x68] sm:$0xff]  }
  0x17   :  { %v348_v11 = vld [vmem:[%s465_s0 + $0x4] ss:$8 sps:$4 sm:$0xff]   ;;  %v351_v12 = vld [vmem:[%s465_s0 + $0x14] ss:$8 sps:$4 sm:$0xff]   ;;  %v346_v18 = vld [vmem:[%s465_s0] ss:$8 sps:$4 sm:$0xff]  }
  0x18   :  { %v341_v13 = vld [vmem:[#allocation2 + $0x28] sm:$0xff]   ;;  %v342_v14 = vld [vmem:[#allocation2 + $0x70] sm:$0xff]   ;;  %221 = vmatprep.mubr.bf16.mxu0 %v348_v11  ;;  %229 = vmatprep.mubr.bf16.mxu1 %v351_v12  ;;  %v344_v16 = vld [vmem:[#allocation2 + $0x78] sm:$0xff]  }
  0x19   :  { %283 = vmatpush3.bf16.msra.mxu0 %v333_v3  ;;  %317 = vmatpush3.bf16.msra.mxu1 %v333_v3  ;;  %v343_v15 = vld [vmem:[#allocation2 + $0x30] sm:$0xff]   ;;  %v345_v17 = vld [vmem:[#allocation2 + $0x38] sm:$0xff]   ;;  %v259_v22 = vld [vmem:[%s467_s2] ss:$0 sm:$0xff] }
  0x1a   :  { %284 = vmatprep.subr.bf16.mxu0 %v334_v4  ;;  %310 = vmatprep.subr.bf16.mxu1 %v334_v4  ;;  %v349_v19 = vld [vmem:[%s465_s0 + $0x10] ss:$8 sps:$4 sm:$0xff]   ;;  %s374_s0 = scalar_lea.vmem %s248_s9, 512 }
  0x1b   :  { %p375_p8 = scmp.ne.s32.totalorder %s248_s9, %s374_s0  ;;  %p380_p10 = scmp.lt.s32.totalorder %s374_s0, %s374_s0 }
  0x1d   :  { %285 = vmatpush3.bf16.msra.mxu0 %v335_v5  ;;  %318 = vmatpush3.bf16.msra.mxu1 %v335_v5  ;;  %p381_p11 = por %p380_p10, %p379_p9 }
  0x1e   :  { %286 = vmatprep.subr.bf16.mxu0 %v336_v6  ;;  %311 = vmatprep.subr.bf16.mxu1 %v336_v6 }
  0x1f   :  { %p382_p12 = pnand %p381_p11, %p375_p8 }
  0x21   :  { %287 = vmatpush3.bf16.msra.mxu0 %v337_v7  ;;  %319 = vmatpush3.bf16.msra.mxu1 %v337_v7 }
  0x22   :  { %288 = vmatprep.subr.bf16.mxu0 %v338_v8  ;;  %312 = vmatprep.subr.bf16.mxu1 %v338_v8 }
  0x25   :  { %289 = vmatpush3.bf16.msra.mxu0 %v339_v9  ;;  %320 = vmatpush3.bf16.msra.mxu1 %v339_v9 }
  0x26   :  { %290 = vmatprep.subr.bf16.mxu0 %v340_v10  ;;  %313 = vmatprep.subr.bf16.mxu1 %v340_v10 }
  0x29   :  { %291 = vmatpush3.bf16.msra.mxu0 %v341_v13  ;;  %321 = vmatpush3.bf16.msra.mxu1 %v341_v13 }
  0x2a   :  { %292 = vmatprep.subr.bf16.mxu0 %v342_v14  ;;  %314 = vmatprep.subr.bf16.mxu1 %v342_v14 }
  0x2d   :  { %293 = vmatpush3.bf16.msra.mxu0 %v343_v15  ;;  %322 = vmatpush3.bf16.msra.mxu1 %v343_v15 }
  0x2e   :  { %294 = vmatprep.subr.bf16.mxu0 %v344_v16  ;;  %315 = vmatprep.subr.bf16.mxu1 %v344_v16 }
  0x31   :  { %295 = vmatpush3.bf16.msra.mxu0 %v345_v17  ;;  %323 = vmatpush3.bf16.msra.mxu1 %v345_v17 }
  0x34   :  { %222 = vmatmul.mubr.bf16.vlgmr.msra.gmra.mrb[0].mxu0 %v346_v18  ;;  %230 = vmatmul.mubr.bf16.vlgmr.msra.gmra.mrb[0].mxu1 %v349_v19 }
 0x107   :  { %v296_v20 = vpop.f32.mrb[0].mxu0  ;;  %v302_v21 = vpop.f32.mrb[0].mxu1 }
 0x108   :  { %v297_v23 = vpop.f32.mrb[1].mxu0  ;;  %v303_v24 = vpop.f32.mrb[1].mxu1 }
 0x109   :  { %v298_v25 = vadd.f32 %v297_v23, %v296_v20  ;;  %v304_v26 = vadd.f32 %v303_v24, %v302_v21  ;;  %v299_v27 = vpop.f32.mrb[2].mxu0  ;;  %v305_v28 = vpop.f32.mrb[2].mxu1 }
 0x10a   :  { %v300_v29 = vpop.f32.mrb[3].mxu0  ;;  %v306_v30 = vpop.f32.mrb[3].mxu1 }
 0x10b   :  { %v224_v31 = vadd.f32 %v298_v25, %v259_v22  ;;  %v232_v32 = vadd.f32 %v304_v26, %v259_v22  ;;  %v301_v33 = vadd.f32 %v300_v29, %v299_v27  ;;  %v307_v34 = vadd.f32 %v306_v30, %v305_v28 }
 0x10d   :  { %238 = vst [vmem:[#allocation5] sm:$0xff] %v224_v31  ;;  %240 = vst [vmem:[#allocation5 + $0x10] sm:$0xff] %v232_v32  ;;  %v227_v35 = vadd.f32 %v301_v33, %v259_v22  ;;  %v235_v36 = vadd.f32 %v307_v34, %v259_v22 }
 0x10f   :  { %239 = vst [vmem:[#allocation5 + $0x8] sm:$0xff] %v227_v35  ;;  %241 = vst [vmem:[#allocation5 + $0x18] sm:$0xff] %v235_v36 }
 0x110   :  { %385 = shalt.err (!%p382_p12)
}
 0x111   :  { %s386_s11 = scalar_lea.hbm %s468_s3, 512 }
 0x112   :  { %p387_p13 = scmp.ne.s32.totalorder %s468_s3, %s386_s11  ;;  %p390_p0 = scmp.lt.u32.totalorder %s386_s11, %s468_s3 }
 0x114   :  { %p392_p1 = pnand %p390_p0, %p387_p13 }
 0x116   :  { %395 = shalt.err (!%p392_p1)
}
 0x117   :  { %s404_s16 = smov 128   ;;  %s405_s17 = smov 8  }
 0x118   :  { %253 = dma.vmem_to_hbm [thread:$0]  %s248_s9, 512, %s468_s3, [#allocation4], %s404_s16, %s404_s16, %s405_s17  }
 0x119   :  { %398 = dma.done.wait [#allocation4], 512  }
 0x11a   :  { %399 = vsyncadd [#allocation4], 4294966784 }
 0x11b   :  { %257 = vsyncpa [#allocation3], 1 }
 0x11c   :  { %258 = vsyncpa [#allocation4], 1 }

</bundles_post_ra>
